<compile_context>
chip_gen: v6e
topology: v6e:2x2x1
jax: 0.10.0
libtpu: 0.0.40
codegen_flags: <defaults>
</compile_context>

<pallas_src>
from functools import lru_cache

import numpy as np
import jax
import jax.numpy as jnp
from jax.experimental import pallas as pl
from jax.experimental.pallas import tpu as pltpu


def _round_up(x: int, m: int) -> int:
    return ((x + m - 1) // m) * m


# ----------------------------------------------------------------------------
# Kernel: one batch tile of  forecast = theta @ W  on the MXU.
# ----------------------------------------------------------------------------
def _forecast_kernel(theta_ref, w_ref, forecast_ref):
    forecast_ref[...] = jnp.dot(
        theta_ref[...], w_ref[...],
        preferred_element_type=jnp.float32,
    ).astype(forecast_ref.dtype)


# ----------------------------------------------------------------------------
# Interpolation weight matrices (PyTorch F.interpolate semantics,
# align_corners=False).
# ----------------------------------------------------------------------------
def _cubic_coeffs(t, A=-0.75):
    # PyTorch get_cubic_upsample_coefficients (a = -0.75).
    def near(x):   # |x| <= 1
        return (A + 2.0) * x ** 3 - (A + 3.0) * x ** 2 + 1.0

    def far(x):    # 1 < |x| < 2
        return A * x ** 3 - 5.0 * A * x ** 2 + 8.0 * A * x - 4.0 * A

    return (far(t + 1.0), near(t), near(1.0 - t), far(2.0 - t))


@lru_cache(maxsize=None)
def _interp_matrix_np(n_knots: int, forecast_size: int, mode: str) -> np.ndarray:
    """W such that F.interpolate(knots[:, None, :], forecast_size, mode)[:, 0, :]
    == knots @ W.  Cached as NumPy (device neutral); uploaded per call."""
    j = np.arange(forecast_size)
    scale = n_knots / forecast_size
    W = np.zeros((n_knots, forecast_size), dtype=np.float64)
    if mode == "nearest":
        src = np.minimum(np.floor(j * scale).astype(np.int64), n_knots - 1)
        W[src, j] = 1.0
    elif mode == "linear":
        x = np.maximum((j + 0.5) * scale - 0.5, 0.0)
        i0 = np.minimum(np.floor(x).astype(np.int64), n_knots - 1)
        i1 = np.minimum(i0 + 1, n_knots - 1)
        w = x - i0
        np.add.at(W, (i0, j), 1.0 - w)
        np.add.at(W, (i1, j), w)
    elif "cubic" in mode:
        # F.interpolate(knots[:, None, None, :], size, mode='bicubic') with an
        # input height of 1 reduces to 1-D cubic-convolution interpolation
        # along the knot axis (the height weights sum to 1); border clamp as
        # in PyTorch.  The 'cubic-<batch>' chunking in the module does not
        # change the result, so the batch suffix is ignored here.
        x = (j + 0.5) * scale - 0.5          # no clamp at 0 for cubic in PyTorch
        i0 = np.floor(x).astype(np.int64)
        t = x - i0
        for off, wgt in zip((-1, 0, 1, 2), _cubic_coeffs(t)):
            idx = np.clip(i0 + off, 0, n_knots - 1)
            np.add.at(W, (idx, j), wgt)
    else:
        raise ValueError(f"unsupported interpolation_mode: {mode}")
    return W.astype(np.float32)


# ----------------------------------------------------------------------------
# Wrapper
# ----------------------------------------------------------------------------
def identity_basis_forward(backcast_theta, forecast_theta, encoder_x_t, decoder_x_t,
                           *, backcast_size, forecast_size, interpolation_mode,
                           batch_tile=None):
    # encoder_x_t / decoder_x_t are unused by the PyTorch module as well.
    del encoder_x_t, decoder_x_t
    B, n_knots = forecast_theta.shape
    assert backcast_theta.shape == (B, backcast_size)

    dtype = forecast_theta.dtype
    W = jnp.asarray(_interp_matrix_np(n_knots, forecast_size, interpolation_mode),
                    dtype=dtype)   # native bf16 MXU path when thetas are bf16

    # VMEM-budgeted batch tile: double-buffered theta + forecast rows capped
    # at ~12 MiB (safe on v7x's 64 MiB VMEM, generous on v5e/v6e).  Keep >=4
    # grid steps when B is large so the "parallel" axis can shard across
    # v7x's two TensorCores.
    itemsize = jnp.dtype(dtype).itemsize
    bytes_per_row = 2 * (n_knots + forecast_size) * itemsize
    vmem_budget = 12 * 1024 * 1024
    tb_budget = max(8, (vmem_budget // bytes_per_row) // 8 * 8)
    if batch_tile is None:
        tb = min(tb_budget, max(8, _round_up(pl.cdiv(B, 4), 8)))
    else:
        tb = batch_tile            # must be a multiple of 8
    tb = min(tb, _round_up(B, 8))

    grid = (pl.cdiv(B, tb),)       # ragged last block: Pallas clips the writes

    forecast = pl.pallas_call(
        _forecast_kernel,
        out_shape=jax.ShapeDtypeStruct((B, forecast_size), dtype),
        grid=grid,
        in_specs=[
            pl.BlockSpec((tb, n_knots), lambda i: (i, 0)),
            # Constant index_map -> W stays VMEM-resident, not re-DMA'd per step.
            pl.BlockSpec((n_knots, forecast_size), lambda i: (0, 0)),
        ],
        out_specs=pl.BlockSpec((tb, forecast_size), lambda i: (i, 0)),
        compiler_params=pltpu.CompilerParams(
            dimension_semantics=("parallel",),     # v7x: shard batch over 2 TCs
            vmem_limit_bytes=32 * 1024 * 1024,
        ),
    )(forecast_theta, W)

    backcast = backcast_theta   # identity path: no kernel traffic at all
    return backcast, forecast


# ----------------------------------------------------------------------------
# Independent reference (element-wise gather interpolation, PyTorch semantics)
# ----------------------------------------------------------------------------
def _interp_reference_np(knots, forecast_size, mode):
    knots = np.asarray(knots, dtype=np.float64)
    _, n = knots.shape
    j = np.arange(forecast_size)
    scale = n / forecast_size
    if mode == "nearest":
        src = np.minimum(np.floor(j * scale).astype(np.int64), n - 1)
        return knots[:, src]
    if mode == "linear":
        x = np.maximum((j + 0.5) * scale - 0.5, 0.0)
        i0 = np.minimum(np.floor(x).astype(np.int64), n - 1)
        i1 = np.minimum(i0 + 1, n - 1)
        w = x - i0
        return knots[:, i0] * (1.0 - w) + knots[:, i1] * w
    # bicubic (height-1 input -> 1-D cubic convolution along knots)
    x = (j + 0.5) * scale - 0.5
    i0 = np.floor(x).astype(np.int64)
    t = x - i0
    out = np.zeros((knots.shape[0], forecast_size))
    for off, wgt in zip((-1, 0, 1, 2), _cubic_coeffs(t)):
        idx = np.clip(i0 + off, 0, n - 1)
        out += knots[:, idx] * wgt
    return out


if __name__ == "__main__":
    # Small shapes consistent with the module's forward.
    B, backcast_size, n_knots, forecast_size = 8, 16, 8, 24

    key = jax.random.PRNGKey(0)
    k1, k2, k3, k4 = jax.random.split(key, 4)
    backcast_theta = jax.random.normal(k1, (B, backcast_size), dtype=jnp.float32)
    forecast_theta = jax.random.normal(k2, (B, n_knots), dtype=jnp.float32)
    # Unused covariates (kept to mirror the PyTorch signature).
    encoder_x_t = jax.random.normal(k3, (B, backcast_size, 1), dtype=jnp.float32)
    decoder_x_t = jax.random.normal(k4, (B, forecast_size, 1), dtype=jnp.float32)

    for mode in ("linear", "nearest", "cubic-4"):
        backcast, forecast = identity_basis_forward(
            backcast_theta, forecast_theta, encoder_x_t, decoder_x_t,
            backcast_size=backcast_size, forecast_size=forecast_size,
            interpolation_mode=mode)
        jax.block_until_ready((backcast, forecast))

        np.testing.assert_array_equal(np.asarray(backcast),
                                      np.asarray(backcast_theta))
        ref = _interp_reference_np(np.asarray(forecast_theta), forecast_size, mode)
        np.testing.assert_allclose(np.asarray(forecast), ref,
                                   rtol=1e-5, atol=1e-5)

    # Exercise the multi-step grid + ragged last batch block path.
    B2 = 200
    ft2 = jax.random.normal(jax.random.PRNGKey(1), (B2, n_knots), dtype=jnp.float32)
    bt2 = jnp.zeros((B2, backcast_size), dtype=jnp.float32)
    _, fc2 = identity_basis_forward(
        bt2, ft2, None, None,
        backcast_size=backcast_size, forecast_size=forecast_size,
        interpolation_mode="linear", batch_tile=64)
    jax.block_until_ready(fc2)
    ref2 = _interp_reference_np(np.asarray(ft2), forecast_size, "linear")
    np.testing.assert_allclose(np.asarray(fc2), ref2, rtol=1e-5, atol=1e-5)

    print("KERNEL_OK")
</pallas_src>

<mosaic_0001>
module attributes {stable_mosaic.version = 11 : i64} {
  func.func @_forecast_kernel(%arg0: i32, %arg1: memref<8x8xf32, #tpu.memory_space<vmem>>, %arg2: memref<8x24xf32, #tpu.memory_space<vmem>>, %arg3: memref<8x24xf32, #tpu.memory_space<vmem>>) attributes {dimension_semantics = [#tpu.dimension_semantics<parallel>], iteration_bounds = array<i64: 1>, scalar_prefetch = 0 : i64, scratch_operands = 0 : i64, tpu.core_type = #tpu.core_type<tc>, window_params = [{transform_indices = @transform_0, window_bounds = array<i64: 8, 8>}, {pipeline_mode = #tpu.pipeline_mode<synchronous>, transform_indices = @transform_1, window_bounds = array<i64: 8, 24>}, {transform_indices = @transform_2, window_bounds = array<i64: 8, 24>}]} {
    %c0 = arith.constant 0 : index
    %c0_0 = arith.constant 0 : index
    %0 = vector.load %arg1[%c0, %c0_0] : memref<8x8xf32, #tpu.memory_space<vmem>>, vector<8x8xf32>
    %c0_1 = arith.constant 0 : index
    %c0_2 = arith.constant 0 : index
    %1 = vector.load %arg2[%c0_1, %c0_2] : memref<8x24xf32, #tpu.memory_space<vmem>>, vector<8x24xf32>
    %cst = arith.constant dense<0.000000e+00> : vector<8x24xf32>
    %2 = tpu.matmul %0, %1, %cst {dimension_numbers = #tpu.dot_dimension_numbers<[1], [0], [0], [1], [0, 0, 1, 1], [], []>} : vector<8x8xf32>, vector<8x24xf32>, vector<8x24xf32> -> vector<8x24xf32>
    %c0_3 = arith.constant 0 : index
    %c0_4 = arith.constant 0 : index
    %3 = vector.load %arg3[%c0_3, %c0_4] : memref<8x24xf32, #tpu.memory_space<vmem>>, vector<8x24xf32>
    tpu.vector_store %arg3[%c0_3, %c0_4], %2 {strides = array<i32>} : memref<8x24xf32, #tpu.memory_space<vmem>>, vector<8x24xf32>,
    return
  }
  func.func @transform_0(%arg0: i32) -> (i32, i32) {
    %c0_i32 = arith.constant 0 : i32
    %c0_i32_0 = arith.constant 0 : i32
    return %arg0, %c0_i32 : i32, i32
  }
  func.func @transform_1(%arg0: i32) -> (i32, i32) {
    %c0_i32 = arith.constant 0 : i32
    %c0_i32_0 = arith.constant 0 : i32
    %c0_i32_1 = arith.constant 0 : i32
    return %c0_i32, %c0_i32_0 : i32, i32
  }
  func.func @transform_2(%arg0: i32) -> (i32, i32) {
    %c0_i32 = arith.constant 0 : i32
    %c0_i32_0 = arith.constant 0 : i32
    return %arg0, %c0_i32 : i32, i32
  }
}

</mosaic_0001>

<bundles_post_ra>
// kernel: tpu_custom_call.1
= control target key start
LH: loop header
LB: loop body
LE: loop exit
PB: predicated region body
PF: predicated region fallthrough
CT: control target
= control target key end

     0   :  { %7 = vsyncpa [#allocation3], 0  ;;  %s238_s0 = inlined_call_operand.hbm [shape: f32[8,8], index: 0, kind: input, shape index: {}]   ;;  %s239_s1 = inlined_call_operand.hbm [shape: f32[8,24], index: 1, kind: input, shape index: {}]   ;;  %s240_s2 = inlined_call_operand.hbm [shape: f32[8,24], index: 2, kind: output, shape index: {}]  }
   0x1   :  { %8 = vsyncpa [#allocation6], 0 }
   0x2   :  { %9 = vsyncpa [#allocation4], 0  ;;  %s209_s9 = smov [#allocation2]   ;;  %s210_s11 = smov [#allocation5]  }
   0x3   :  { %s16_s10 = sshll.u32 %s209_s9, 4  ;;  %s26_s12 = sshll.u32 %s210_s11, 4  ;;  %s17_s10 = int_to_ptr.vmem [resolvable:$true] %s16_s10  ;;  %s27_s12 = int_to_ptr.vmem [resolvable:$true] %s26_s12 }
   0x4   :  { %s151_s13 = scalar_lea.vmem %s17_s10, 128  ;;  %p156_p1 = scmp.lt.s32.totalorder %s17_s10, %s17_s10 }
   0x5   :  { %p152_p0 = scmp.ne.s32.totalorder %s17_s10, %s151_s13  ;;  %p157_p2 = scmp.lt.s32.totalorder %s151_s13, %s151_s13 }
   0x7   :  { %p158_p3 = por %p157_p2, %p156_p1 }
   0x9   :  { %p159_p4 = pnand %p158_p3, %p152_p0 }
   0xb   :  { %162 = shalt.err (!%p159_p4)
}
   0xc   :  { %19 = dma.hbm_to_vmem [thread:$0]  %s238_s0, 128, %s17_s10, [#allocation3]  }
   0xd   :  { %s171_s16 = scalar_lea.vmem %s27_s12, 128  ;;  %p176_p6 = scmp.lt.s32.totalorder %s27_s12, %s27_s12 }
   0xe   :  { %p172_p5 = scmp.ne.s32.totalorder %s27_s12, %s171_s16  ;;  %p177_p7 = scmp.lt.s32.totalorder %s171_s16, %s171_s16 }
  0x10   :  { %p178_p8 = por %p177_p7, %p176_p6 }
  0x12   :  { %p179_p9 = pnand %p178_p8, %p172_p5 }
  0x14   :  { %182 = shalt.err (!%p179_p9)
}
  0x15   :  { %29 = dma.hbm_to_vmem [thread:$0]  %s239_s1, 128, %s27_s12, [#allocation6]  }
  0x16   :  { %203 = dma.done.wait [#allocation3], 128  }
  0x17   :  { %204 = vsyncadd [#allocation3], 4294967168 }
  0x18   :  { %205 = dma.done.wait [#allocation6], 128  }
  0x19   :  { %206 = vsyncadd [#allocation6], 4294967168  ;;  %v211_v0 = vmov 0.0   ;;  %vm212_vm0 = vmmov 0   ;;  %vm38_vm1 = vcmask 64512   ;;  %v37_v1 = vld [vmem:[#allocation5] sm:$0xff] }
  0x1a   :  { %133 = vmatprep.subr.mxu0 %v211_v0  ;;  %135 = vmatprep.mubr.msk.f32.mxu0 %vm212_vm0, %v211_v0  ;;  %v36_v2 = vld [vmem:[#allocation2] sm:$0xff]  ;;  %s213_s0 = smov [#allocation7]   ;;  %vm112_vm2 = vcmask 195584  }
  0x1b   :  { %134 = vmatpush3.msra.mxu0 %v37_v1  ;;  %s120_s19 = sshll.u32 %s213_s0, 4  ;;  %s121_s19 = int_to_ptr.vmem [resolvable:$true] %s120_s19 }
  0x1c   :  { %136 = vmatmul.mubr.msk.f32.vlgmr.msra.gmra.mxu0 %vm38_vm1, %v36_v2  ;;  %s183_s1 = scalar_lea.vmem %s121_s19, 128  ;;  %p188_p11 = scmp.lt.s32.totalorder %s121_s19, %s121_s19 }
  0x1d   :  { %p184_p10 = scmp.ne.s32.totalorder %s121_s19, %s183_s1  ;;  %p189_p12 = scmp.lt.s32.totalorder %s183_s1, %s183_s1 }
  0x1f   :  { %p190_p13 = por %p189_p12, %p188_p11 }
  0x21   :  { %p191_p0 = pnand %p190_p13, %p184_p10 }
  0xdc   :  { %v108_v3 = vpop.f32.mrf.mxu0 }
  0xdd   :  { %113 = vst.msk [vmem:[#allocation7] sm:$0xff] %vm112_vm2, %v108_v3 }
  0xde   :  { %v137_v4 = vpop.f32.mrf.mxu0 }
  0xdf   :  { %194 = shalt.err (!%p191_p0)
}
  0xe0   :  { %123 = dma.vmem_to_hbm [thread:$0]  %s121_s19, 128, %s240_s2, [#allocation4]  }
  0xe1   :  { %207 = dma.done.wait [#allocation4], 128  }
  0xe2   :  { %208 = vsyncadd [#allocation4], 4294967168 }
  0xe3   :  { %127 = vsyncpa [#allocation3], 1 }
  0xe4   :  { %128 = vsyncpa [#allocation6], 1 }
  0xe5   :  { %129 = vsyncpa [#allocation4], 1 }

</bundles_post_ra>
